<compile_context>
chip_gen: v5e
topology: v5e:2x2
jax: 0.10.0
libtpu: 0.0.40
codegen_flags: <defaults>
</compile_context>

<pallas_src>
import jax
import jax.numpy as jnp
from jax.experimental import pallas as pl
from jax.experimental.pallas import tpu as pltpu


def _round_up(n, m):
    return ((n + m - 1) // m) * m


def _fused_kernel(x_ref, y_ref, wxt_ref, wyt_ref, bx_ref, by_ref, out_ref):
    """out = 0.5 * ((x @ WxT + bx) + (y @ WyT + by))  -- mode == 0."""
    acc = jnp.dot(x_ref[...], wxt_ref[...], preferred_element_type=jnp.float32)
    acc = acc + jnp.dot(y_ref[...], wyt_ref[...],
                        preferred_element_type=jnp.float32)
    out_ref[...] = ((acc + bx_ref[...] + by_ref[...]) * 0.5).astype(out_ref.dtype)


def _pair_kernel(x_ref, y_ref, wxt_ref, wyt_ref, bx_ref, by_ref,
                 xo_ref, yo_ref):
    """(x @ WxT + bx, y @ WyT + by)  -- mode != 0."""
    xo_ref[...] = (jnp.dot(x_ref[...], wxt_ref[...],
                           preferred_element_type=jnp.float32)
                   + bx_ref[...]).astype(xo_ref.dtype)
    yo_ref[...] = (jnp.dot(y_ref[...], wyt_ref[...],
                           preferred_element_type=jnp.float32)
                   + by_ref[...]).astype(yo_ref.dtype)


def _pick_batch_tile(B, block_b):
    """Sublane-aligned batch tile; >=2 grid steps when B permits (megacore)."""
    bb = min(block_b, _round_up(B, 8))
    if B > 8:
        # Cap so the grid has at least 2 steps -> both v7x TensorCores busy.
        bb = min(bb, max(8, _round_up(pl.cdiv(B, 2), 8)))
    return max(bb, 8)


def sum_fusion(x, y, wx, bx, wy, by, mode=0, block_b=512, compute_dtype=None):
    """Pallas implementation of SumFusion.forward.

    x, y:   [B, D]
    wx, wy: [O, D]   (PyTorch nn.Linear weight layout)
    bx, by: [O]
    compute_dtype: optional MXU operand dtype (e.g. jnp.bfloat16); the
                   accumulation stays f32 either way.
    """
    B, D = x.shape
    O = wx.shape[0]
    out_dtype = x.dtype

    # --- One-time wrapper-side layout work (not per grid step) -------------
    # Natural MXU (K, N) layout for the RHS, lane-dense (padded) output dim.
    O_pad = _round_up(O, 128)
    wxt = jnp.transpose(wx)                         # [D, O]
    wyt = jnp.transpose(wy)                         # [D, O]
    bx2 = bx
    by2 = by
    if O_pad != O:
        wxt = jnp.pad(wxt, ((0, 0), (0, O_pad - O)))
        wyt = jnp.pad(wyt, ((0, 0), (0, O_pad - O)))
        bx2 = jnp.pad(bx2, (0, O_pad - O))
        by2 = jnp.pad(by2, (0, O_pad - O))
    bx2 = bx2.astype(jnp.float32).reshape(1, O_pad)
    by2 = by2.astype(jnp.float32).reshape(1, O_pad)

    if compute_dtype is not None:
        x = x.astype(compute_dtype)
        y = y.astype(compute_dtype)
        wxt = wxt.astype(compute_dtype)
        wyt = wyt.astype(compute_dtype)

    # --- Batch tiling: sublane-aligned tile + cdiv grid (masked tail) ------
    bb = _pick_batch_tile(B, block_b)
    grid = (pl.cdiv(B, bb),)

    x_spec = pl.BlockSpec((bb, D), lambda i: (i, 0))
    w_spec = pl.BlockSpec((D, O_pad), lambda i: (0, 0))   # resident across steps
    b_spec = pl.BlockSpec((1, O_pad), lambda i: (0, 0))
    o_spec = pl.BlockSpec((bb, O_pad), lambda i: (i, 0))

    # --- VMEM / cost hints ---------------------------------------------------
    in_itemsize = jnp.dtype(x.dtype).itemsize
    out_itemsize = jnp.dtype(out_dtype).itemsize
    vmem_needed = (2 * 2 * bb * D * in_itemsize           # x, y (double-buffered)
                   + 2 * 2 * D * O_pad * in_itemsize      # weights (conservative)
                   + 2 * 2 * bb * O_pad * out_itemsize    # output(s)
                   + 4 * O_pad * 4)                       # biases
    # TODO(synk): for very large O*D on v7x (64 MiB VMEM) also tile O / D with
    # an f32 accumulator scratch; not needed at these sizes.
    vmem_limit = int(min(max(2 * vmem_needed, 32 * 1024 * 1024),
                         100 * 1024 * 1024))
    params = pltpu.CompilerParams(dimension_semantics=("parallel",),
                                  vmem_limit_bytes=vmem_limit)
    cost = pl.CostEstimate(
        flops=4 * B * D * O_pad,                           # two GEMMs
        transcendentals=0,
        bytes_accessed=(2 * B * D * in_itemsize + 2 * D * O_pad * in_itemsize
                        + 2 * O_pad * 4 + 2 * B * O_pad * out_itemsize))

    if mode == 0:
        out = pl.pallas_call(
            _fused_kernel,
            grid=grid,
            in_specs=[x_spec, x_spec, w_spec, w_spec, b_spec, b_spec],
            out_specs=o_spec,
            out_shape=jax.ShapeDtypeStruct((B, O_pad), out_dtype),
            compiler_params=params,
            cost_estimate=cost,
        )(x, y, wxt, wyt, bx2, by2)
        return out[:, :O] if O_pad != O else out
    else:
        x_out, y_out = pl.pallas_call(
            _pair_kernel,
            grid=grid,
            in_specs=[x_spec, x_spec, w_spec, w_spec, b_spec, b_spec],
            out_specs=[o_spec, o_spec],
            out_shape=[jax.ShapeDtypeStruct((B, O_pad), out_dtype),
                       jax.ShapeDtypeStruct((B, O_pad), out_dtype)],
            compiler_params=params,
            cost_estimate=cost,
        )(x, y, wxt, wyt, bx2, by2)
        if O_pad != O:
            x_out, y_out = x_out[:, :O], y_out[:, :O]
        return x_out, y_out


if __name__ == "__main__":
    # Small shapes consistent with the module (Linear(input_dim, output_dim)).
    B, D, O = 16, 512, 100

    key = jax.random.PRNGKey(0)
    kx, ky, kwx, kbx, kwy, kby = jax.random.split(key, 6)

    x = jax.random.normal(kx, (B, D), dtype=jnp.float32)
    y = jax.random.normal(ky, (B, D), dtype=jnp.float32)

    # Deterministic parameter init (PyTorch-Linear-like uniform bound 1/sqrt(D)).
    bound = 1.0 / (D ** 0.5)
    wx = jax.random.uniform(kwx, (O, D), minval=-bound, maxval=bound,
                            dtype=jnp.float32)
    bx = jax.random.uniform(kbx, (O,), minval=-bound, maxval=bound,
                            dtype=jnp.float32)
    wy = jax.random.uniform(kwy, (O, D), minval=-bound, maxval=bound,
                            dtype=jnp.float32)
    by = jax.random.uniform(kby, (O,), minval=-bound, maxval=bound,
                            dtype=jnp.float32)

    # mode=0 path (averaged sum).
    out = sum_fusion(x, y, wx, bx, wy, by, mode=0)
    out = jax.block_until_ready(out)

    # mode!=0 path (return the two linear outputs).
    x_out, y_out = sum_fusion(x, y, wx, bx, wy, by, mode=1)
    jax.block_until_ready((x_out, y_out))

    # Reference check against plain JAX.
    ref_x = x @ wx.T + bx
    ref_y = y @ wy.T + by
    ref = (ref_x + ref_y) / 2.0
    assert out.shape == (B, O) and x_out.shape == (B, O) and y_out.shape == (B, O)
    assert jnp.allclose(out, ref, atol=1e-4, rtol=1e-5)
    assert jnp.allclose(x_out, ref_x, atol=1e-4, rtol=1e-5)
    assert jnp.allclose(y_out, ref_y, atol=1e-4, rtol=1e-5)

    print("KERNEL_OK")
</pallas_src>

<mosaic_0001>
module attributes {stable_mosaic.version = 11 : i64} {
  func.func @_fused_kernel(%arg0: i32, %arg1: memref<8x512xf32, #tpu.memory_space<vmem>>, %arg2: memref<8x512xf32, #tpu.memory_space<vmem>>, %arg3: memref<512x128xf32, #tpu.memory_space<vmem>>, %arg4: memref<512x128xf32, #tpu.memory_space<vmem>>, %arg5: memref<1x128xf32, #tpu.memory_space<vmem>>, %arg6: memref<1x128xf32, #tpu.memory_space<vmem>>, %arg7: memref<8x128xf32, #tpu.memory_space<vmem>>) attributes {dimension_semantics = [#tpu.dimension_semantics<parallel>], iteration_bounds = array<i64: 2>, scalar_prefetch = 0 : i64, scratch_operands = 0 : i64, tpu.core_type = #tpu.core_type<tc>, window_params = [{transform_indices = @transform_0, window_bounds = array<i64: 8, 512>}, {transform_indices = @transform_1, window_bounds = array<i64: 8, 512>}, {pipeline_mode = #tpu.pipeline_mode<synchronous>, transform_indices = @transform_2, window_bounds = array<i64: 512, 128>}, {pipeline_mode = #tpu.pipeline_mode<synchronous>, transform_indices = @transform_3, window_bounds = array<i64: 512, 128>}, {pipeline_mode = #tpu.pipeline_mode<synchronous>, transform_indices = @transform_4, window_bounds = array<i64: 1, 128>}, {pipeline_mode = #tpu.pipeline_mode<synchronous>, transform_indices = @transform_5, window_bounds = array<i64: 1, 128>}, {transform_indices = @transform_6, window_bounds = array<i64: 8, 128>}]} {
    %c0 = arith.constant 0 : index
    %c0_0 = arith.constant 0 : index
    %0 = vector.load %arg1[%c0, %c0_0] : memref<8x512xf32, #tpu.memory_space<vmem>>, vector<8x512xf32>
    %c0_1 = arith.constant 0 : index
    %c0_2 = arith.constant 0 : index
    %1 = vector.load %arg3[%c0_1, %c0_2] : memref<512x128xf32, #tpu.memory_space<vmem>>, vector<512x128xf32>
    %cst = arith.constant dense<0.000000e+00> : vector<8x128xf32>
    %2 = tpu.matmul %0, %1, %cst {dimension_numbers = #tpu.dot_dimension_numbers<[1], [0], [0], [1], [0, 0, 1, 1], [], []>} : vector<8x512xf32>, vector<512x128xf32>, vector<8x128xf32> -> vector<8x128xf32>
    %c0_3 = arith.constant 0 : index
    %c0_4 = arith.constant 0 : index
    %3 = vector.load %arg2[%c0_3, %c0_4] : memref<8x512xf32, #tpu.memory_space<vmem>>, vector<8x512xf32>
    %c0_5 = arith.constant 0 : index
    %c0_6 = arith.constant 0 : index
    %4 = vector.load %arg4[%c0_5, %c0_6] : memref<512x128xf32, #tpu.memory_space<vmem>>, vector<512x128xf32>
    %cst_7 = arith.constant dense<0.000000e+00> : vector<8x128xf32>
    %5 = tpu.matmul %3, %4, %cst_7 {dimension_numbers = #tpu.dot_dimension_numbers<[1], [0], [0], [1], [0, 0, 1, 1], [], []>} : vector<8x512xf32>, vector<512x128xf32>, vector<8x128xf32> -> vector<8x128xf32>
    %6 = arith.addf %2, %5 : vector<8x128xf32>
    %c0_8 = arith.constant 0 : index
    %c0_9 = arith.constant 0 : index
    %7 = vector.load %arg5[%c0_8, %c0_9] : memref<1x128xf32, #tpu.memory_space<vmem>>, vector<1x128xf32>
    %8 = vector.broadcast %7 : vector<1x128xf32> to vector<8x128xf32>
    %9 = arith.addf %6, %8 : vector<8x128xf32>
    %c0_10 = arith.constant 0 : index
    %c0_11 = arith.constant 0 : index
    %10 = vector.load %arg6[%c0_10, %c0_11] : memref<1x128xf32, #tpu.memory_space<vmem>>, vector<1x128xf32>
    %11 = vector.broadcast %10 : vector<1x128xf32> to vector<8x128xf32>
    %12 = arith.addf %9, %11 : vector<8x128xf32>
    %cst_12 = arith.constant 5.000000e-01 : f32
    %13 = vector.broadcast %cst_12 : f32 to vector<8x128xf32>
    %14 = arith.mulf %12, %13 : vector<8x128xf32>
    %c0_13 = arith.constant 0 : index
    %c0_14 = arith.constant 0 : index
    %15 = vector.load %arg7[%c0_13, %c0_14] : memref<8x128xf32, #tpu.memory_space<vmem>>, vector<8x128xf32>
    tpu.vector_store %arg7[%c0_13, %c0_14], %14 {strides = array<i32>} : memref<8x128xf32, #tpu.memory_space<vmem>>, vector<8x128xf32>,
    return
  }
  func.func @transform_0(%arg0: i32) -> (i32, i32) {
    %c0_i32 = arith.constant 0 : i32
    %c0_i32_0 = arith.constant 0 : i32
    return %arg0, %c0_i32 : i32, i32
  }
  func.func @transform_1(%arg0: i32) -> (i32, i32) {
    %c0_i32 = arith.constant 0 : i32
    %c0_i32_0 = arith.constant 0 : i32
    return %arg0, %c0_i32 : i32, i32
  }
  func.func @transform_2(%arg0: i32) -> (i32, i32) {
    %c0_i32 = arith.constant 0 : i32
    %c0_i32_0 = arith.constant 0 : i32
    %c0_i32_1 = arith.constant 0 : i32
    return %c0_i32, %c0_i32_0 : i32, i32
  }
  func.func @transform_3(%arg0: i32) -> (i32, i32) {
    %c0_i32 = arith.constant 0 : i32
    %c0_i32_0 = arith.constant 0 : i32
    %c0_i32_1 = arith.constant 0 : i32
    return %c0_i32, %c0_i32_0 : i32, i32
  }
  func.func @transform_4(%arg0: i32) -> (i32, i32) {
    %c0_i32 = arith.constant 0 : i32
    %c0_i32_0 = arith.constant 0 : i32
    %c0_i32_1 = arith.constant 0 : i32
    return %c0_i32, %c0_i32_0 : i32, i32
  }
  func.func @transform_5(%arg0: i32) -> (i32, i32) {
    %c0_i32 = arith.constant 0 : i32
    %c0_i32_0 = arith.constant 0 : i32
    %c0_i32_1 = arith.constant 0 : i32
    return %c0_i32, %c0_i32_0 : i32, i32
  }
  func.func @transform_6(%arg0: i32) -> (i32, i32) {
    %c0_i32 = arith.constant 0 : i32
    %c0_i32_0 = arith.constant 0 : i32
    return %arg0, %c0_i32 : i32, i32
  }
}

</mosaic_0001>

<bundles_post_ra>
// kernel: tpu_custom_call.1
= control target key start
LH: loop header
LB: loop body
LE: loop exit
PB: predicated region body
PF: predicated region fallthrough
CT: control target
= control target key end

     0   :  { %s1312_s0 = inlined_call_operand.hbm [shape: f32[16,512], index: 0, kind: input, shape index: {}]   ;;  %s1313_s1 = inlined_call_operand.hbm [shape: f32[16,512], index: 1, kind: input, shape index: {}]   ;;  %s1314_s2 = inlined_call_operand.hbm [shape: f32[512,128], index: 2, kind: input, shape index: {}]   ;;  %s1315_s3 = inlined_call_operand.hbm [shape: f32[512,128], index: 3, kind: input, shape index: {}]   ;;  %s1316_s4 = inlined_call_operand.vmem [shape: f32[1,128], index: 4, kind: input, shape index: {}]   ;;  %s1317_s5 = inlined_call_operand.vmem [shape: f32[1,128], index: 5, kind: input, shape index: {}]   ;;  %s1318_s6 = inlined_call_operand.hbm [shape: f32[16,128], index: 6, kind: output, shape index: {}]  }
   0x1   :  { %1322 = sst [smem:[#allocation19_spill]] %s1314_s2 }
   0x2   :  { %1323 = sst [smem:[#allocation20_spill]] %s1315_s3 }
   0x3   :  { %11 = vsyncpa [#allocation3], 0 }
   0x4   :  { %13 = vsyncpa [#allocation3 + $0x1], 0 }
   0x5   :  { %14 = vsyncpa [#allocation6], 0 }
   0x6   :  { %16 = vsyncpa [#allocation6 + $0x1], 0 }
   0x7   :  { %17 = vsyncpa [#allocation9], 0 }
   0x8   :  { %18 = vsyncpa [#allocation4], 0 }
   0x9   :  { %20 = vsyncpa [#allocation4 + $0x1], 0  ;;  %s1117_s21 = smov 0   ;;  %s1119_s22 = smov 0  }
   0xa   :  { %s1121_s23 = smov 0   ;;  %s1123_s24 = smov 0  }
   0xb LB: > { %1324 = sst [smem:[#allocation16_spill]] %s1072_s23  ;;  %s1141_s28 = sadd.s32 4294967295, %s1076_s24   ;;  %s1076_s24 = sphi %s1123_s24, %s1336_s24   ;;  %s1072_s23 = sphi %s1121_s23, %s1338_s23   ;;  %s1068_s22 = sphi %s1119_s22, %s1340_s22   ;;  %s1064_s21 = sphi %s1117_s21, %s1339_s21  }
   0xc   : > { %s1325_s2 = sld [smem:[#allocation19_spill]]  ;;  %p780_p0 = scmp.ge.s32.totalorder %s1076_s24, 1 }
   0xd   : > { %p47_p1 = scmp.eq.s32.totalorder %s1141_s28, 0  ;;  %p193_p2 = scmp.lt.s32.totalorder %s1076_s24, 3 }
   0xe   : > { %s1078_s30 = smov [#allocation7]   ;;  %s1327_s3 = sld [smem:[#allocation20_spill]] }
   0xf   : > { %p1146_p3 = pnand %p780_p0, %p193_p2  ;;  %s206_s7 = sshll.u32 %s1078_s30, 4  ;;  %s207_s7 = int_to_ptr.vmem [resolvable:$true] %s206_s7 }
  0x10   : > { %s1079_s11 = smov [#allocation8]   ;;  %s1080_s13 = smov 128  }
  0x11   : > { %p816_p4 = pneg %p1146_p3  ;;  %s220_s12 = sshll.u32 %s1079_s11, 4  ;;  %s221_s12 = int_to_ptr.vmem [resolvable:$true] %s220_s12 }
  0x12   : > { %s204_s27 = sshll.u32 %s1325_s2, 4  ;;  %s1081_s14 = smov 8   ;;  %s205_s27 = int_to_ptr.hbm [resolvable:$true] %s204_s27 }
  0x13   : > { %p817_p6 = pnand %p816_p4, %p47_p1  ;;  %s779_s15 = sadd.s32 4294967294, %s1076_s24  }
  0x14   : > { %s218_s10 = sshll.u32 %s1327_s3, 4  ;;  %s1160_s16 = sadd.s32 1, %s1076_s24   ;;  %s219_s10 = int_to_ptr.hbm [resolvable:$true] %s218_s10 }
  0x15   : > { %819 = dma.hbm_to_vmem [thread:$0]  (!%p817_p6), %s205_s27, 8192, %s207_s7, [#allocation6], %s1080_s13, %s1080_s13, %s1081_s14  }
  0x16   : > { %822 = dma.hbm_to_vmem [thread:$0]  (!%p817_p6), %s219_s10, 8192, %s221_s12, [#allocation9], %s1080_s13, %s1080_s13, %s1081_s14  }
  0x17   : > { %1328 = sst [smem:[#allocation17_spill]] %s1160_s16  ;;  %s30_s17 = ssub.s32 %s1076_s24, %s1160_s16 }
  0x18   : > { %s33_s18 = sadd.s32 1, %s1072_s23  ;;  %p31_p7 = scmp.eq.s32.totalorder %s30_s17, 0 }
  0x19   : > { %p40_p8 = scmp.ne.s32.totalorder %s1072_s23, %s1068_s22  ;;  %p41_p9 = scmp.eq.s32.totalorder %s1076_s24, 0 }
  0x1a   : > { %p46_p10 = scmp.ne.s32.totalorder %s1068_s22, %s1064_s21  ;;  %p180_p13 = scmp.eq.s32.totalorder %s1141_s28, 1 }
  0x1b   : > { %s1171_s19 = scalar_select %p31_p7, %s1072_s23, %s33_s18  }
  0x1c   : > { %p1173_p11 = por %p41_p9, %p40_p8  ;;  %p1179_p12 = por %p47_p1, %p46_p10 }
  0x1d   : > { %1329 = sst [smem:[#allocation18_spill]] %s1171_s19  ;;  %p186_p0 = scmp.eq.s32.totalorder %s779_s15, 1 }
  0x1e   : > { %p836_p2 = scmp.lt.s32.totalorder %s1076_s24, 2  ;;  %s240_s26 = sand.u32 1, %s1072_s23  }
  0x1f   : > { %p1186_p4 = por %p180_p13, %p40_p8  ;;  %p1190_p6 = por %p186_p0, %p46_p10 }
  0x20   : > { %s1194_s7 = sshll.u32 %s240_s26, 5  ;;  %s800_s8 = sshll.u32 %s1076_s24, 5 }
  0x21   : > { %s249_s11 = scalar_lea.hbm %s1312_s0, %s800_s8  ;;  %s244_s12 = scalar_lea.vmem [#allocation2], %s1194_s7 }
  0x22   : > { %s253_s13 = sshll.u32 %s244_s12, 4  ;;  %s251_s14 = sshll.u32 %s249_s11, 4  ;;  %s254_s13 = int_to_ptr.vmem [resolvable:$true] %s253_s13  ;;  %s252_s14 = int_to_ptr.hbm [resolvable:$true] %s251_s14 }
  0x23   : > { %p1203_p7 = pnand %p836_p2, %p1173_p11  ;;  %s269_s2 = scalar_lea.hbm %s1313_s1, %s800_s8 }
  0x24   : > { %s260_s3 = sand.u32 1, %s1076_s24   ;;  %s241_s19 = scalar_lea.sflag [#allocation3], %s240_s26 }
  0x25   : > { %s938_s9 = sshra.s32 %s252_s14, 4  ;;  %p942_p9 = pneg %p1203_p7  ;;  %s939_s9 = int_to_ptr.hbm [resolvable:$true] %s938_s9 }
  0x26   : > { %s940_s10 = scalar_lea.hbm %s939_s9, 32  ;;  %s945_s12 = scalar_lea.hbm %s1312_s0, 64 }
  0x27   : > { %p941_p8 = scmp.ne.s32.totalorder %s939_s9, %s940_s10  ;;  %p946_p13 = scmp.lt.s32.totalorder %s939_s9, %s1312_s0 }
  0x28   : > { %p947_p0 = scmp.lt.s32.totalorder %s945_s12, %s940_s10 }
  0x29   : > { %p943_p10 = pnand %p942_p9, %p941_p8 }
  0x2a   : > { %p948_p2 = por %p947_p0, %p946_p13 }
  0x2b   : > { %p944_p11 = pneg %p943_p10 }
  0x2d   : > { %p949_p5 = pnand %p948_p2, %p944_p11 }
  0x2f   : > { %952 = shalt.err (!%p949_p5)
}
  0x30   : > { %826 = dma.hbm_to_vmem [thread:$0]  (!%p1203_p7), %s252_s14, 512, %s254_s13, %s241_s19  }
  0x31   : > { %s271_s26 = sshll.u32 %s269_s2, 4  ;;  %s264_s8 = scalar_lea.vmem [#allocation5], %s1194_s7  ;;  %s272_s26 = int_to_ptr.hbm [resolvable:$true] %s271_s26 }
  0x32   : > { %s273_s23 = sshll.u32 %s264_s8, 4  ;;  %s261_s20 = scalar_lea.sflag [#allocation6], %s260_s3  ;;  %s274_s23 = int_to_ptr.vmem [resolvable:$true] %s273_s23 }
  0x33   : > { %s968_s11 = sshra.s32 %s272_s26, 4  ;;  %s975_s12 = scalar_lea.hbm %s1313_s1, 64  ;;  %s969_s11 = int_to_ptr.hbm [resolvable:$true] %s968_s11 }
  0x34   : > { %s970_s16 = scalar_lea.hbm %s969_s11, 32  ;;  %p976_p5 = scmp.lt.s32.totalorder %s969_s11, %s1313_s1 }
  0x35   : > { %p971_p8 = scmp.ne.s32.totalorder %s969_s11, %s970_s16  ;;  %p977_p13 = scmp.lt.s32.totalorder %s975_s12, %s970_s16 }
  0x37   : > { %p973_p10 = pnand %p971_p8, %p942_p9  ;;  %p978_p0 = por %p977_p13, %p976_p5 }
  0x39   : > { %p974_p11 = pneg %p973_p10 }
  0x3b   : > { %p979_p2 = pnand %p978_p0, %p974_p11 }
  0x3d   : > { %982 = shalt.err (!%p979_p2)
}
  0x3e   : > { %829 = dma.hbm_to_vmem [thread:$0]  (!%p1203_p7), %s272_s26, 512, %s274_s23, %s261_s20  }
  0x3f   : > { %282 = sbr.rel (%p1146_p3) target bundleno = 288 (0x120), region = 44  ;;  %s1239_s2 = sand.u32 (!%p1146_p3), 1, %s1068_s22  }
  0x40   : > { %s791_s3 = sshll.u32 (!%p1146_p3), %s1239_s2, 5  ;;  %s285_s7 = scalar_lea.sflag (!%p1146_p3), [#allocation3], %s1239_s2 }
  0x41   : > { %s1243_s13 = scalar_lea.vmem (!%p1146_p3), [#allocation2], %s791_s3 }
  0x44   : > { %1043 = dma.done.wait (%p1179_p12), %s285_s7, 512  }
  0x45   : > { %1045 = vsyncadd (%p1179_p12), %s285_s7, 4294966784  ;;  %s294_s23 = sand.u32 1, %s1141_s28   ;;  %s1250_s16 = scalar_lea.vmem [#allocation5], %s791_s3 }
  0x46   : > { %s295_s29 = scalar_lea.sflag [#allocation6], %s294_s23 }
  0x47   : > { %1047 = dma.done.wait (%p1179_p12), %s295_s29, 512  }
  0x48   : > { %1049 = vsyncadd (%p1179_p12), %s295_s29, 4294966784 }
  0x49   : > { %1051 = dma.done.wait (%p47_p1), [#allocation6], 8192  }
  0x4a   : > { %1053 = vsyncadd (%p47_p1), [#allocation6], 4294959104 }
  0x4b   : > { %1055 = dma.done.wait (%p47_p1), [#allocation9], 8192  }
  0x4c   : > { %1057 = vsyncadd (%p47_p1), [#allocation9], 4294959104  ;;  %v430_v0 = vld [vmem:[#allocation8 + $0x78] sm:$0xff]  ;;  %v429_v2 = vld [vmem:[#allocation8 + $0x70] sm:$0xff]  ;;  %s795_s25 = sshll.u32 %s1239_s2, 3  ;;  %s797_s14 = sshll.u32 %s1141_s28, 3 }
  0x4d   : > { %v462_v1 = vld [vmem:[#allocation8 + $0x178] sm:$0xff]  ;;  %479 = vmatpush.msra.mxu0 %v430_v0  ;;  %v461_v4 = vld [vmem:[#allocation8 + $0x170] sm:$0xff]  ;;  %v428_v6 = vld [vmem:[#allocation8 + $0x68] sm:$0xff]  ;;  %s662_s9 = scalar_lea.hbm %s1318_s6, %s797_s14  ;;  %s342_s10 = scalar_lea.vmem [#allocation10], %s795_s25 }
  0x4e   : > { %519 = vmatpush.msra.mxu2 %v462_v1  ;;  %v446_v3 = vld [vmem:[#allocation8 + $0xf8] sm:$0xff]  ;;  %v445_v7 = vld [vmem:[#allocation8 + $0xf0] sm:$0xff]  ;;  %v460_v8 = vld [vmem:[#allocation8 + $0x168] sm:$0xff]  ;;  %s664_s28 = sshll.u32 %s342_s10, 4  ;;  %s666_s12 = sshll.u32 %s662_s9, 4  ;;  %s665_s28 = int_to_ptr.vmem [resolvable:$true] %s664_s28  ;;  %s667_s12 = int_to_ptr.hbm [resolvable:$true] %s666_s12 }
  0x4f   : > { %v478_v5 = vld [vmem:[#allocation8 + $0x1f8] sm:$0xff]  ;;  %499 = vmatpush.msra.mxu1 %v446_v3  ;;  %480 = vmatpush.msra.mxu0 %v429_v2  ;;  %v477_v9 = vld [vmem:[#allocation8 + $0x1f0] sm:$0xff]  ;;  %v444_v10 = vld [vmem:[#allocation8 + $0xe8] sm:$0xff]  ;;  %s652_s17 = scalar_lea.sflag [#allocation4], %s1239_s2  ;;  %s1012_s19 = sshra.s32 %s667_s12, 4  ;;  %s1013_s19 = int_to_ptr.hbm [resolvable:$true] %s1012_s19 }
  0x50   : > { %539 = vmatpush.msra.mxu3 %v478_v5  ;;  %520 = vmatpush.msra.mxu2 %v461_v4  ;;  %v427_v11 = vld [vmem:[#allocation8 + $0x60] sm:$0xff]  ;;  %v476_v13 = vld [vmem:[#allocation8 + $0x1e8] sm:$0xff]  ;;  %v426_v16 = vld [vmem:[#allocation8 + $0x58] sm:$0xff]  ;;  %s1014_s3 = scalar_lea.hbm %s1013_s19, 8  ;;  %s1018_s23 = scalar_lea.hbm %s1318_s6, 16 }
  0x51   : > { %500 = vmatpush.msra.mxu1 %v445_v7  ;;  %v459_v12 = vld [vmem:[#allocation8 + $0x160] sm:$0xff]  ;;  %481 = vmatpush.msra.mxu0 %v428_v6  ;;  %v458_v17 = vld [vmem:[#allocation8 + $0x158] sm:$0xff]  ;;  %v425_v20 = vld [vmem:[#allocation8 + $0x50] sm:$0xff]  ;;  %p1015_p1 = scmp.ne.s32.totalorder %s1013_s19, %s1014_s3  ;;  %p1019_p7 = scmp.lt.s32.totalorder %s1013_s19, %s1318_s6 }
  0x52   : > { %540 = vmatpush.msra.mxu3 %v477_v9  ;;  %521 = vmatpush.msra.mxu2 %v460_v8  ;;  %v443_v14 = vld [vmem:[#allocation8 + $0xe0] sm:$0xff]  ;;  %v442_v18 = vld [vmem:[#allocation8 + $0xd8] sm:$0xff]  ;;  %v457_v21 = vld [vmem:[#allocation8 + $0x150] sm:$0xff]  ;;  %p1020_p9 = scmp.lt.s32.totalorder %s1018_s23, %s1014_s3 }
  0x53   : > { %v475_v15 = vld [vmem:[#allocation8 + $0x1e0] sm:$0xff]  ;;  %501 = vmatpush.msra.mxu1 %v444_v10  ;;  %482 = vmatpush.msra.mxu0 %v427_v11  ;;  %v474_v19 = vld [vmem:[#allocation8 + $0x1d8] sm:$0xff]  ;;  %v441_v22 = vld [vmem:[#allocation8 + $0xd0] sm:$0xff]  ;;  %p1016_p3 = pnand %p1015_p1, %p1186_p4 }
  0x54   : > { %541 = vmatpush.msra.mxu3 %v476_v13  ;;  %522 = vmatpush.msra.mxu2 %v459_v12  ;;  %v473_v23 = vld [vmem:[#allocation8 + $0x1d0] sm:$0xff]  ;;  %v424_v24 = vld [vmem:[#allocation8 + $0x48] sm:$0xff]  ;;  %v423_v28 = vld [vmem:[#allocation8 + $0x40] sm:$0xff]  ;;  %p1021_p8 = por %p1020_p9, %p1019_p7 }
  0x55   : > { %502 = vmatpush.msra.mxu1 %v443_v14  ;;  %483 = vmatpush.msra.mxu0 %v426_v16  ;;  %v456_v25 = vld [vmem:[#allocation8 + $0x148] sm:$0xff]  ;;  %v455_v29 = vld [vmem:[#allocation8 + $0x140] sm:$0xff]  ;;  %v422_v32 = vld [vmem:[#allocation8 + $0x38] sm:$0xff]  ;;  %p1017_p12 = pneg %p1016_p3 }
  0x56   : > { %542 = vmatpush.msra.mxu3 %v475_v15  ;;  %523 = vmatpush.msra.mxu2 %v458_v17  ;;  %v440_v26 = vld [vmem:[#allocation8 + $0xc8] sm:$0xff]  ;;  %v439_v30 = vld [vmem:[#allocation8 + $0xc0] sm:$0xff]  ;;  %v454_v33 = vld [vmem:[#allocation8 + $0x138] sm:$0xff] }
  0x57   : > { %503 = vmatpush.msra.mxu1 %v442_v18  ;;  %484 = vmatpush.msra.mxu0 %v425_v20  ;;  %v472_v27 = vld [vmem:[#allocation8 + $0x1c8] sm:$0xff]  ;;  %v471_v31 = vld [vmem:[#allocation8 + $0x1c0] sm:$0xff]  ;;  %v438_v34 = vld [vmem:[#allocation8 + $0xb8] sm:$0xff]  ;;  %p1022_p10 = pnand %p1021_p8, %p1017_p12 }
  0x58   : > { %543 = vmatpush.msra.mxu3 %v474_v19  ;;  %524 = vmatpush.msra.mxu2 %v457_v21  ;;  %v470_v35 = vld [vmem:[#allocation8 + $0x1b8] sm:$0xff]  ;;  %v421_v36 = vld [vmem:[#allocation8 + $0x30] sm:$0xff]  ;;  %v420_v40 = vld [vmem:[#allocation8 + $0x28] sm:$0xff] }
  0x59   : > { %504 = vmatpush.msra.mxu1 %v441_v22  ;;  %485 = vmatpush.msra.mxu0 %v424_v24  ;;  %v453_v37 = vld [vmem:[#allocation8 + $0x130] sm:$0xff]  ;;  %v452_v41 = vld [vmem:[#allocation8 + $0x128] sm:$0xff]  ;;  %v419_v44 = vld [vmem:[#allocation8 + $0x20] sm:$0xff] }
  0x5a   : > { %544 = vmatpush.msra.mxu3 %v473_v23  ;;  %525 = vmatpush.msra.mxu2 %v456_v25  ;;  %v437_v38 = vld [vmem:[#allocation8 + $0xb0] sm:$0xff]  ;;  %v436_v42 = vld [vmem:[#allocation8 + $0xa8] sm:$0xff]  ;;  %v451_v45 = vld [vmem:[#allocation8 + $0x120] sm:$0xff] }
  0x5b   : > { %505 = vmatpush.msra.mxu1 %v440_v26  ;;  %486 = vmatpush.msra.mxu0 %v423_v28  ;;  %v469_v39 = vld [vmem:[#allocation8 + $0x1b0] sm:$0xff]  ;;  %v468_v43 = vld [vmem:[#allocation8 + $0x1a8] sm:$0xff]  ;;  %v435_v46 = vld [vmem:[#allocation8 + $0xa0] sm:$0xff] }
  0x5c   : > { %545 = vmatpush.msra.mxu3 %v472_v27  ;;  %526 = vmatpush.msra.mxu2 %v455_v29  ;;  %v467_v47 = vld [vmem:[#allocation8 + $0x1a0] sm:$0xff]  ;;  %v418_v48 = vld [vmem:[#allocation8 + $0x18] sm:$0xff]  ;;  %v417_v52 = vld [vmem:[#allocation8 + $0x10] sm:$0xff] }
  0x5d   : > { %506 = vmatpush.msra.mxu1 %v439_v30  ;;  %487 = vmatpush.msra.mxu0 %v422_v32  ;;  %v450_v49 = vld [vmem:[#allocation8 + $0x118] sm:$0xff]  ;;  %v449_v53 = vld [vmem:[#allocation8 + $0x110] sm:$0xff]  ;;  %v416_v56 = vld [vmem:[#allocation8 + $0x8] sm:$0xff] }
  0x5e   : > { %546 = vmatpush.msra.mxu3 %v471_v31  ;;  %527 = vmatpush.msra.mxu2 %v454_v33  ;;  %v434_v50 = vld [vmem:[#allocation8 + $0x98] sm:$0xff]  ;;  %v433_v54 = vld [vmem:[#allocation8 + $0x90] sm:$0xff]  ;;  %v448_v57 = vld [vmem:[#allocation8 + $0x108] sm:$0xff] }
  0x5f   : > { %507 = vmatpush.msra.mxu1 %v438_v34  ;;  %488 = vmatpush.msra.mxu0 %v421_v36  ;;  %v466_v51 = vld [vmem:[#allocation8 + $0x198] sm:$0xff]  ;;  %v465_v55 = vld [vmem:[#allocation8 + $0x190] sm:$0xff]  ;;  %v432_v58 = vld [vmem:[#allocation8 + $0x88] sm:$0xff] }
  0x60   : > { %547 = vmatpush.msra.mxu3 %v470_v35  ;;  %528 = vmatpush.msra.mxu2 %v453_v37  ;;  %v464_v59 = vld [vmem:[#allocation8 + $0x188] sm:$0xff]  ;;  %v415_v60 = vld [vmem:[#allocation8] sm:$0xff]  ;;  %v362_v62 = vld [vmem:[#allocation7 + $0x78] sm:$0xff] }
  0x61   : > { %508 = vmatpush.msra.mxu1 %v437_v38  ;;  %489 = vmatpush.msra.mxu0 %v420_v40  ;;  %v447_v61 = vld [vmem:[#allocation8 + $0x100] sm:$0xff]  ;;  %v394_v63 = vld [vmem:[#allocation7 + $0x178] sm:$0xff]  ;;  %v361_v2 = vld [vmem:[#allocation7 + $0x70] sm:$0xff] }
  0x62   : > { %548 = vmatpush.msra.mxu3 %v469_v39  ;;  %529 = vmatpush.msra.mxu2 %v452_v41  ;;  %v431_v0 = vld [vmem:[#allocation8 + $0x80] sm:$0xff]  ;;  %v378_v3 = vld [vmem:[#allocation7 + $0xf8] sm:$0xff]  ;;  %v393_v4 = vld [vmem:[#allocation7 + $0x170] sm:$0xff] }
  0x63   : > { %509 = vmatpush.msra.mxu1 %v436_v42  ;;  %490 = vmatpush.msra.mxu0 %v419_v44  ;;  %v463_v1 = vld [vmem:[#allocation8 + $0x180] sm:$0xff]  ;;  %v410_v5 = vld [vmem:[#allocation7 + $0x1f8] sm:$0xff]  ;;  %v360_v6 = vld [vmem:[#allocation7 + $0x68] sm:$0xff] }
  0x64   : > { %549 = vmatpush.msra.mxu3 %v468_v43  ;;  %530 = vmatpush.msra.mxu2 %v451_v45  ;;  %v377_v7 = vld [vmem:[#allocation7 + $0xf0] sm:$0xff]  ;;  %v392_v8 = vld [vmem:[#allocation7 + $0x168] sm:$0xff]  ;;  %v359_v10 = vld [vmem:[#allocation7 + $0x60] sm:$0xff] }
  0x65   : > { %510 = vmatpush.msra.mxu1 %v435_v46  ;;  %491 = vmatpush.msra.mxu0 %v418_v48  ;;  %v409_v9 = vld [vmem:[#allocation7 + $0x1f0] sm:$0xff]  ;;  %v376_v11 = vld [vmem:[#allocation7 + $0xe8] sm:$0xff]  ;;  %v391_v12 = vld [vmem:[#allocation7 + $0x160] sm:$0xff] }
  0x66   : > { %550 = vmatpush.msra.mxu3 %v467_v47  ;;  %531 = vmatpush.msra.mxu2 %v450_v49  ;;  %v408_v13 = vld [vmem:[#allocation7 + $0x1e8] sm:$0xff]  ;;  %v358_v14 = vld [vmem:[#allocation7 + $0x58] sm:$0xff]  ;;  %v375_v15 = vld [vmem:[#allocation7 + $0xe0] sm:$0xff] }
  0x67   : > { %511 = vmatpush.msra.mxu1 %v434_v50  ;;  %492 = vmatpush.msra.mxu0 %v417_v52  ;;  %v390_v16 = vld [vmem:[#allocation7 + $0x158] sm:$0xff]  ;;  %v407_v17 = vld [vmem:[#allocation7 + $0x1e0] sm:$0xff]  ;;  %v357_v18 = vld [vmem:[#allocation7 + $0x50] sm:$0xff] }
  0x68   : > { %551 = vmatpush.msra.mxu3 %v466_v51  ;;  %532 = vmatpush.msra.mxu2 %v449_v53  ;;  %v374_v19 = vld [vmem:[#allocation7 + $0xd8] sm:$0xff]  ;;  %v389_v20 = vld [vmem:[#allocation7 + $0x150] sm:$0xff]  ;;  %v356_v22 = vld [vmem:[#allocation7 + $0x48] sm:$0xff] }
  0x69   : > { %512 = vmatpush.msra.mxu1 %v433_v54  ;;  %493 = vmatpush.msra.mxu0 %v416_v56  ;;  %v406_v21 = vld [vmem:[#allocation7 + $0x1d8] sm:$0xff]  ;;  %v373_v23 = vld [vmem:[#allocation7 + $0xd0] sm:$0xff]  ;;  %v388_v24 = vld [vmem:[#allocation7 + $0x148] sm:$0xff] }
  0x6a   : > { %552 = vmatpush.msra.mxu3 %v465_v55  ;;  %533 = vmatpush.msra.mxu2 %v448_v57  ;;  %v405_v25 = vld [vmem:[#allocation7 + $0x1d0] sm:$0xff]  ;;  %v355_v26 = vld [vmem:[#allocation7 + $0x40] sm:$0xff]  ;;  %v372_v27 = vld [vmem:[#allocation7 + $0xc8] sm:$0xff] }
  0x6b   : > { %513 = vmatpush.msra.mxu1 %v432_v58  ;;  %494 = vmatpush.msra.mxu0 %v415_v60  ;;  %v387_v28 = vld [vmem:[#allocation7 + $0x140] sm:$0xff]  ;;  %v404_v29 = vld [vmem:[#allocation7 + $0x1c8] sm:$0xff]  ;;  %v354_v30 = vld [vmem:[#allocation7 + $0x38] sm:$0xff] }
  0x6c   : > { %553 = vmatpush.msra.mxu3 %v464_v59  ;;  %534 = vmatpush.msra.mxu2 %v447_v61  ;;  %v371_v31 = vld [vmem:[#allocation7 + $0xc0] sm:$0xff]  ;;  %v386_v32 = vld [vmem:[#allocation7 + $0x138] sm:$0xff]  ;;  %v353_v34 = vld [vmem:[#allocation7 + $0x30] sm:$0xff] }
  0x6d   : > { %559 = vmatpush.msrb.mxu0 %v362_v62  ;;  %514 = vmatpush.msra.mxu1 %v431_v0  ;;  %v403_v33 = vld [vmem:[#allocation7 + $0x1c0] sm:$0xff]  ;;  %v370_v35 = vld [vmem:[#allocation7 + $0xb8] sm:$0xff]  ;;  %v385_v36 = vld [vmem:[#allocation7 + $0x130] sm:$0xff] }
  0x6e   : > { %599 = vmatpush.msrb.mxu2 %v394_v63  ;;  %554 = vmatpush.msra.mxu3 %v463_v1  ;;  %v402_v37 = vld [vmem:[#allocation7 + $0x1b8] sm:$0xff]  ;;  %v352_v38 = vld [vmem:[#allocation7 + $0x28] sm:$0xff]  ;;  %v369_v39 = vld [vmem:[#allocation7 + $0xb0] sm:$0xff] }
  0x6f   : > { %560 = vmatpush.msrb.mxu0 %v361_v2  ;;  %579 = vmatpush.msrb.mxu1 %v378_v3  ;;  %v384_v40 = vld [vmem:[#allocation7 + $0x128] sm:$0xff]  ;;  %v401_v41 = vld [vmem:[#allocation7 + $0x1b0] sm:$0xff]  ;;  %v351_v43 = vld [vmem:[#allocation7 + $0x20] sm:$0xff] }
  0x70   : > { %600 = vmatpush.msrb.mxu2 %v393_v4  ;;  %619 = vmatpush.msrb.mxu3 %v410_v5  ;;  %v413_v42 = vld [vmem:[%s1250_s16 + $0x10] sm:$0xff]  ;;  %v368_v44 = vld [vmem:[#allocation7 + $0xa8] sm:$0xff]  ;;  %v383_v45 = vld [vmem:[#allocation7 + $0x120] sm:$0xff] }
  0x71   : > { %561 = vmatpush.msrb.mxu0 %v360_v6  ;;  %580 = vmatpush.msrb.mxu1 %v377_v7  ;;  %v400_v46 = vld [vmem:[#allocation7 + $0x1a8] sm:$0xff]  ;;  %v411_v47 = vld [vmem:[%s1250_s16] sm:$0xff]  ;;  %v414_v48 = vld [vmem:[%s1250_s16 + $0x18] sm:$0xff] }
  0x72   : > { %601 = vmatpush.msrb.mxu2 %v392_v8  ;;  %620 = vmatpush.msrb.mxu3 %v409_v9  ;;  %v350_v49 = vld [vmem:[#allocation7 + $0x18] sm:$0xff]  ;;  %v367_v50 = vld [vmem:[#allocation7 + $0xa0] sm:$0xff]  ;;  %v412_v53 = vld [vmem:[%s1250_s16 + $0x8] sm:$0xff] }
  0x73   : > { %562 = vmatpush.msrb.mxu0 %v359_v10  ;;  %581 = vmatpush.msrb.mxu1 %v376_v11  ;;  %v382_v51 = vld [vmem:[#allocation7 + $0x118] sm:$0xff]  ;;  %v399_v52 = vld [vmem:[#allocation7 + $0x1a0] sm:$0xff]  ;;  %v349_v54 = vld [vmem:[#allocation7 + $0x10] sm:$0xff] }
  0x74   : > { %602 = vmatpush.msrb.mxu2 %v391_v12  ;;  %621 = vmatpush.msrb.mxu3 %v408_v13  ;;  %v366_v55 = vld [vmem:[#allocation7 + $0x98] sm:$0xff]  ;;  %v381_v56 = vld [vmem:[#allocation7 + $0x110] sm:$0xff]  ;;  %v348_v58 = vld [vmem:[#allocation7 + $0x8] sm:$0xff] }
  0x75   : > { %563 = vmatpush.msrb.mxu0 %v358_v14  ;;  %582 = vmatpush.msrb.mxu1 %v375_v15  ;;  %v398_v57 = vld [vmem:[#allocation7 + $0x198] sm:$0xff]  ;;  %v365_v59 = vld [vmem:[#allocation7 + $0x90] sm:$0xff]  ;;  %v380_v60 = vld [vmem:[#allocation7 + $0x108] sm:$0xff] }
  0x76   : > { %603 = vmatpush.msrb.mxu2 %v390_v16  ;;  %622 = vmatpush.msrb.mxu3 %v407_v17  ;;  %v397_v61 = vld [vmem:[#allocation7 + $0x190] sm:$0xff]  ;;  %v347_v62 = vld [vmem:[#allocation7] sm:$0xff]  ;;  %v364_v63 = vld [vmem:[#allocation7 + $0x88] sm:$0xff] }
  0x77   : > { %564 = vmatpush.msrb.mxu0 %v357_v18  ;;  %583 = vmatpush.msrb.mxu1 %v374_v19  ;;  %v379_v0 = vld [vmem:[#allocation7 + $0x100] sm:$0xff]  ;;  %v396_v1 = vld [vmem:[#allocation7 + $0x188] sm:$0xff]  ;;  %v345_v3 = vld [vmem:[%s1243_s13 + $0x10] sm:$0xff] }
  0x78   : > { %604 = vmatpush.msrb.mxu2 %v389_v20  ;;  %623 = vmatpush.msrb.mxu3 %v406_v21  ;;  %v343_v2 = vld [vmem:[%s1243_s13] sm:$0xff]  ;;  %v344_v6 = vld [vmem:[%s1243_s13 + $0x8] sm:$0xff]  ;;  %v346_v7 = vld [vmem:[%s1243_s13 + $0x18] sm:$0xff] }
  0x79   : > { %565 = vmatpush.msrb.mxu0 %v356_v22  ;;  %584 = vmatpush.msrb.mxu1 %v373_v23  ;;  %v363_v4 = vld [vmem:[#allocation7 + $0x80] sm:$0xff] }
  0x7a   : > { %605 = vmatpush.msrb.mxu2 %v388_v24  ;;  %624 = vmatpush.msrb.mxu3 %v405_v25  ;;  %v395_v5 = vld [vmem:[#allocation7 + $0x180] sm:$0xff] }
  0x7b   : > { %566 = vmatpush.msrb.mxu0 %v355_v26  ;;  %585 = vmatpush.msrb.mxu1 %v372_v27  ;;  %v876_v21 = vld [vmem:[%s1316_s4] ss:$0 sm:$0xff] }
  0x7c   : > { %606 = vmatpush.msrb.mxu2 %v387_v28  ;;  %625 = vmatpush.msrb.mxu3 %v404_v29  ;;  %v877_v24 = vld [vmem:[%s1317_s5] ss:$0 sm:$0xff] }
  0x7d   : > { %567 = vmatpush.msrb.mxu0 %v354_v30  ;;  %586 = vmatpush.msrb.mxu1 %v371_v31 }
  0x7e   : > { %607 = vmatpush.msrb.mxu2 %v386_v32  ;;  %626 = vmatpush.msrb.mxu3 %v403_v33 }
  0x7f   : > { %568 = vmatpush.msrb.mxu0 %v353_v34  ;;  %587 = vmatpush.msrb.mxu1 %v370_v35 }
  0x80   : > { %608 = vmatpush.msrb.mxu2 %v385_v36  ;;  %627 = vmatpush.msrb.mxu3 %v402_v37 }
  0x81   : > { %569 = vmatpush.msrb.mxu0 %v352_v38  ;;  %588 = vmatpush.msrb.mxu1 %v369_v39 }
  0x82   : > { %609 = vmatpush.msrb.mxu2 %v384_v40  ;;  %628 = vmatpush.msrb.mxu3 %v401_v41 }
  0x83   : > { %535 = vmatmul.f32.vlgmr.msra.gmra.mxu2 %v413_v42  ;;  %570 = vmatpush.msrb.mxu0 %v351_v43 }
  0x84   : > { %589 = vmatpush.msrb.mxu1 %v368_v44  ;;  %610 = vmatpush.msrb.mxu2 %v383_v45 }
  0x85   : > { %629 = vmatpush.msrb.mxu3 %v400_v46  ;;  %495 = vmatmul.f32.vlgmr.msra.gmra.mxu0 %v411_v47 }
  0x86   : > { %555 = vmatmul.f32.vlgmr.msra.gmra.mxu3 %v414_v48  ;;  %571 = vmatpush.msrb.mxu0 %v350_v49 }
  0x87   : > { %590 = vmatpush.msrb.mxu1 %v367_v50  ;;  %611 = vmatpush.msrb.mxu2 %v382_v51 }
  0x88   : > { %630 = vmatpush.msrb.mxu3 %v399_v52  ;;  %515 = vmatmul.f32.vlgmr.msra.gmra.mxu1 %v412_v53 }
  0x89   : > { %572 = vmatpush.msrb.mxu0 %v349_v54  ;;  %591 = vmatpush.msrb.mxu1 %v366_v55 }
  0x8a   : > { %612 = vmatpush.msrb.mxu2 %v381_v56  ;;  %631 = vmatpush.msrb.mxu3 %v398_v57 }
  0x8b   : > { %573 = vmatpush.msrb.mxu0 %v348_v58  ;;  %592 = vmatpush.msrb.mxu1 %v365_v59 }
  0x8c   : > { %613 = vmatpush.msrb.mxu2 %v380_v60  ;;  %632 = vmatpush.msrb.mxu3 %v397_v61 }
  0x8d   : > { %574 = vmatpush.msrb.mxu0 %v347_v62  ;;  %593 = vmatpush.msrb.mxu1 %v364_v63 }
  0x8e   : > { %614 = vmatpush.msrb.mxu2 %v379_v0  ;;  %633 = vmatpush.msrb.mxu3 %v396_v1 }
  0x8f   : > { %575 = vmatmul.f32.vlgmr.msrb.gmra.mxu0 %v343_v2  ;;  %615 = vmatmul.f32.vlgmr.msrb.gmra.mxu2 %v345_v3 }
  0x90   : > { %594 = vmatpush.msrb.mxu1 %v363_v4  ;;  %634 = vmatpush.msrb.mxu3 %v395_v5 }
  0x91   : > { %595 = vmatmul.f32.vlgmr.msrb.gmra.mxu1 %v344_v6  ;;  %635 = vmatmul.f32.vlgmr.msrb.gmra.mxu3 %v346_v7 }
 0x102   : > { %v496_v8 = vpop.f32.mrf.mxu0 }
 0x105   : > { %v516_v9 = vpop.f32.mrf.mxu1 }
 0x106   : > { %v517_v10 = vadd.f32 %v516_v9, %v496_v8  ;;  %v536_v11 = vpop.f32.mrf.mxu2 }
 0x108   : > { %v537_v12 = vadd.f32 %v536_v11, %v517_v10 }
 0x109   : > { %v556_v13 = vpop.f32.mrf.mxu3 }
 0x10a   : > { %v557_v14 = vadd.f32 %v556_v13, %v537_v12 }
 0x10c   : > { %v576_v15 = vpop.f32.mrf.mxu0 }
 0x10d   : > { %v577_v16 = vadd.f32 %v576_v15, %v557_v14 }
 0x10e   : > { %v596_v17 = vpop.f32.mrf.mxu1 }
 0x10f   : > { %v597_v18 = vadd.f32 %v596_v17, %v577_v16 }
 0x112   : > { %v616_v19 = vpop.f32.mrf.mxu2 }
 0x113   : > { %v617_v20 = vadd.f32 %v616_v19, %v597_v18 }
 0x114   : > { %v636_v22 = vpop.f32.mrf.mxu3 }
 0x115   : > { %v637_v23 = vadd.f32 %v636_v22, %v617_v20 }
 0x117   : > { %v643_v25 = vadd.f32 %v876_v21, %v637_v23 }
 0x119   : > { %v648_v26 = vadd.f32 %v877_v24, %v643_v25 }
 0x11b   : > { %v649_v27 = vmul.f32 0.5, %v648_v26 }
 0x11d   : > { %650 = vst [vmem:[%s342_s10] sm:$0xff] %v649_v27 }
 0x11e   : > { %1025 = shalt.err (!%p1022_p10)
}
 0x11f   : > { %814 = dma.vmem_to_hbm [thread:$0]  (%p1186_p4), %s665_s28, 128, %s667_s12, %s652_s17  }
 0x120 PF: > { %s678_s2 = sand.u32 1, %s1064_s21   ;;  %p1335_p11 = scmp.ge.s32.totalorder %s1076_s24, 2 }
 0x121   : > { %s679_s25 = scalar_lea.sflag [#allocation4], %s678_s2 }
 0x122   : > { %p831_p5 = pnand %p1335_p11, %p1190_p6 }
 0x124   : > { %p832_p13 = pneg %p831_p5 }
 0x126   : > { %1059 = dma.done.wait (%p832_p13), %s679_s25, 128  }
 0x127   : > { %1061 = vsyncadd (%p832_p13), %s679_s25, 4294967168  ;;  %s1336_s24 = sld [smem:[#allocation17_spill]]  ;;  %s1339_s21 = smov %s1068_s22 }
 0x128   : > { %s1337_s14 = sld [smem:[#allocation16_spill]] }
 0x129   : > { %s1338_s23 = sld [smem:[#allocation18_spill]] }
 0x12d   : > { %p23_p0 = scmp.ge.s32.totalorder %s1336_s24, 4  }
 0x12e   : > { %s1340_s22 = smov %s1337_s14 }
 0x12f   :  { %25 = sbr.rel (!%p23_p0) target bundleno = 11 (0xb), region = 110 }
 0x134   :  { %685 = vsyncpa [#allocation3], 1 }
 0x135   :  { %687 = vsyncpa [#allocation3 + $0x1], 1 }
 0x136   :  { %688 = vsyncpa [#allocation6], 1 }
 0x137   :  { %690 = vsyncpa [#allocation6 + $0x1], 1 }
 0x138   :  { %691 = vsyncpa [#allocation9], 1 }
 0x139   :  { %692 = vsyncpa [#allocation4], 1 }
 0x13a   :  { %694 = vsyncpa [#allocation4 + $0x1], 1 }

</bundles_post_ra>
